<compile_context>
chip_gen: v6e
topology: v6e:2x2x1
jax: 0.10.0
libtpu: 0.0.40
codegen_flags: <defaults>
</compile_context>

<pallas_src>
import jax
import jax.numpy as jnp
from jax.experimental import pallas as pl
from jax.experimental.pallas import tpu as pltpu

# --- small, module-consistent hyperparameters -------------------------------
BATCH = 2
N_SAMPLES = 16      # n_samples (chain-graph length)
IN_DIM = 8          # in_dim
HIDDEN = 128        # hidden_dim
NUM_LAYERS = 4      # num_layers (GraphBlocks)
OUT_DIM = 1         # out_dim (module default; 'sigmoid' last activation)


def _gcn_kernel(x_ref, a_ref, win_ref, bin_ref, w12_ref, b12_ref,
                wout_ref, bout_ref, o_ref):
    """Whole GraphConvNet forward (all batch rows stacked), entirely in VMEM."""
    A = a_ref[...]                                     # (BN, BN) block-diag, bf16
    x = x_ref[...]                                     # (BN, Din) bf16

    # Input Linear + ReLU (bf16 operands, f32 accumulation)
    h = jnp.dot(x, win_ref[...], preferred_element_type=jnp.float32) + bin_ref[...]
    h = jnp.maximum(h, 0.0)                            # (BN, H) f32

    # GraphBlocks: h <- relu(A @ (h W1 + b1)) + (h W2 + b2)
    # W1|W2 fused: one (BN,H)@(H,2H) matmul per layer, split on lane-aligned
    # static slices.  Static unroll (4 layers); weights indexed statically.
    for l in range(NUM_LAYERS):
        hb = h.astype(jnp.bfloat16)
        z = jnp.dot(hb, w12_ref[l], preferred_element_type=jnp.float32) + b12_ref[l]
        z1 = z[:, :HIDDEN]                             # graph-path pre-activation
        z2 = z[:, HIDDEN:]                             # residual path
        # Graph mixing: bf16 x bf16 MXU op, f32 accumulation (A entries are
        # {0, 0.5, 1.0}, exactly representable in bf16).
        y = jnp.dot(A, z1.astype(jnp.bfloat16), preferred_element_type=jnp.float32)
        h = jnp.maximum(y, 0.0) + z2

    # Final Linear (out_dim == 1) as VPU multiply by the W_out row + lane reduce.
    logits = jnp.sum(h * wout_ref[...], axis=-1, keepdims=True) + bout_ref[...]
    o_ref[...] = jax.nn.sigmoid(logits)                # (BN, 1)


def graph_conv_net(x, A_chain, params):
    """x: (B*N_SAMPLES, IN_DIM) -> (B*N_SAMPLES, OUT_DIM); matches torch forward."""
    assert OUT_DIM == 1, "VPU output projection assumes out_dim == 1 (module default)"
    win, bin_, w1s, b1s, w2s, b2s, wout, bout = params
    BN = x.shape[0]
    assert BN % N_SAMPLES == 0
    B = BN // N_SAMPLES

    # Exact block-diagonal adjacency over the stacked batch rows; bf16 is
    # bit-exact for the row-normalized chain graph ({0, 0.5, 1.0}).
    A_bd = jnp.kron(jnp.eye(B, dtype=jnp.float32),
                    A_chain.astype(jnp.float32)).astype(jnp.bfloat16)

    # bf16 MXU operands (accumulation stays f32 in-kernel); biases f32.
    x16 = x.astype(jnp.bfloat16)
    win16 = win.astype(jnp.bfloat16)
    w12s16 = jnp.concatenate([w1s, w2s], axis=-1).astype(jnp.bfloat16)   # (L,H,2H)
    b12s = jnp.concatenate([b1s, b2s], axis=-1).astype(jnp.float32)      # (L,1,2H)
    wout_row = wout.reshape(1, HIDDEN).astype(jnp.float32)               # (H,1)->(1,H)

    inputs = (x16, A_bd, win16, bin_, w12s16, b12s, wout_row, bout)

    flops = int(2 * BN * IN_DIM * HIDDEN
                + NUM_LAYERS * (2 * BN * HIDDEN * (2 * HIDDEN) + 2 * BN * BN * HIDDEN)
                + 2 * BN * HIDDEN)
    bytes_accessed = int(sum(a.size * a.dtype.itemsize for a in inputs)
                         + BN * OUT_DIM * 4)

    vmem = lambda: pl.BlockSpec(memory_space=pltpu.MemorySpace.VMEM)
    out = pl.pallas_call(
        _gcn_kernel,
        out_shape=jax.ShapeDtypeStruct((BN, OUT_DIM), jnp.float32),
        in_specs=[vmem() for _ in inputs],
        out_specs=vmem(),
        cost_estimate=pl.CostEstimate(flops=flops, transcendentals=BN,
                                      bytes_accessed=bytes_accessed),
    )(*inputs)
    return out                                          # already (B*N, 1) == .view(-1, 1)


def make_adjacency(n):
    """W = offdiag(-1) + offdiag(+1), row-normalized — same as the module."""
    W = jnp.diag(jnp.ones(n - 1), -1) + jnp.diag(jnp.ones(n - 1), 1)
    W = W / jnp.sum(W, axis=1, keepdims=True)
    return W.astype(jnp.float32)


def init_params(key):
    """Deterministic nn.Linear-style init: U(-1/sqrt(fan_in), 1/sqrt(fan_in))."""
    ks = jax.random.split(key, 10)

    def lin(kw, kb, fan_in, fan_out, stack=None):
        bound = 1.0 / (fan_in ** 0.5)
        wshape = (fan_in, fan_out) if stack is None else (stack, fan_in, fan_out)
        bshape = (1, fan_out) if stack is None else (stack, 1, fan_out)
        w = jax.random.uniform(kw, wshape, jnp.float32, -bound, bound)
        b = jax.random.uniform(kb, bshape, jnp.float32, -bound, bound)
        return w, b

    win, bin_ = lin(ks[0], ks[1], IN_DIM, HIDDEN)
    w1s, b1s = lin(ks[2], ks[3], HIDDEN, HIDDEN, stack=NUM_LAYERS)
    w2s, b2s = lin(ks[4], ks[5], HIDDEN, HIDDEN, stack=NUM_LAYERS)
    wout, bout = lin(ks[6], ks[7], HIDDEN, OUT_DIM)
    return (win, bin_, w1s, b1s, w2s, b2s, wout, bout)


def reference_forward(x, A, params):
    """Pure-JAX f32 reference mirroring the PyTorch module semantics."""
    win, bin_, w1s, b1s, w2s, b2s, wout, bout = params
    B = x.shape[0] // N_SAMPLES
    h = x.reshape(B, N_SAMPLES, IN_DIM)
    h = jax.nn.relu(h @ win + bin_)
    for l in range(NUM_LAYERS):
        y = jnp.einsum("nm,bmh->bnh", A, h @ w1s[l] + b1s[l])
        h = jax.nn.relu(y) + (h @ w2s[l] + b2s[l])
    out = h @ wout + bout
    return jax.nn.sigmoid(out.reshape(-1, OUT_DIM))


if __name__ == "__main__":
    key = jax.random.PRNGKey(0)
    kx, kp = jax.random.split(key)

    x = jax.random.normal(kx, (BATCH * N_SAMPLES, IN_DIM), dtype=jnp.float32)
    A = make_adjacency(N_SAMPLES)
    params = init_params(kp)

    out = jax.block_until_ready(graph_conv_net(x, A, params))
    ref = reference_forward(x, A, params)

    assert out.shape == (BATCH * N_SAMPLES, OUT_DIM)
    # bf16 MXU operands (x, weights, A, z1) with f32 accumulation vs. the
    # pure-f32 reference: observed max abs diff is O(1e-3); 2e-2 is a wide margin.
    assert jnp.allclose(out, ref, atol=2e-2, rtol=2e-2), "mismatch vs reference"

    print("KERNEL_OK")
</pallas_src>

<mosaic_0001>
module attributes {stable_mosaic.version = 11 : i64} {
  func.func @_gcn_kernel(%arg0: memref<32x8xbf16, #tpu.memory_space<vmem>>, %arg1: memref<32x32xbf16, #tpu.memory_space<vmem>>, %arg2: memref<8x128xbf16, #tpu.memory_space<vmem>>, %arg3: memref<1x128xf32, #tpu.memory_space<vmem>>, %arg4: memref<4x128x256xbf16, #tpu.memory_space<vmem>>, %arg5: memref<4x1x256xf32, #tpu.memory_space<vmem>>, %arg6: memref<1x128xf32, #tpu.memory_space<vmem>>, %arg7: memref<1x1xf32, #tpu.memory_space<vmem>>, %arg8: memref<32x1xf32, #tpu.memory_space<vmem>>) attributes {dimension_semantics = [], scalar_prefetch = 0 : i64, scratch_operands = 0 : i64, tpu.core_type = #tpu.core_type<tc>} {
    %c0 = arith.constant 0 : index
    %c0_0 = arith.constant 0 : index
    %0 = vector.load %arg1[%c0, %c0_0] : memref<32x32xbf16, #tpu.memory_space<vmem>>, vector<32x32xbf16>
    %c0_1 = arith.constant 0 : index
    %c0_2 = arith.constant 0 : index
    %1 = vector.load %arg0[%c0_1, %c0_2] : memref<32x8xbf16, #tpu.memory_space<vmem>>, vector<32x8xbf16>
    %c0_3 = arith.constant 0 : index
    %c0_4 = arith.constant 0 : index
    %2 = vector.load %arg2[%c0_3, %c0_4] : memref<8x128xbf16, #tpu.memory_space<vmem>>, vector<8x128xbf16>
    %cst = arith.constant dense<0.000000e+00> : vector<32x128xf32>
    %3 = tpu.matmul %1, %2, %cst {dimension_numbers = #tpu.dot_dimension_numbers<[1], [0], [0], [1], [0, 0, 1, 1], [], []>} : vector<32x8xbf16>, vector<8x128xbf16>, vector<32x128xf32> -> vector<32x128xf32>
    %c0_5 = arith.constant 0 : index
    %c0_6 = arith.constant 0 : index
    %4 = vector.load %arg3[%c0_5, %c0_6] : memref<1x128xf32, #tpu.memory_space<vmem>>, vector<1x128xf32>
    %5 = vector.broadcast %4 : vector<1x128xf32> to vector<32x128xf32>
    %6 = arith.addf %3, %5 : vector<32x128xf32>
    %cst_7 = arith.constant 0.000000e+00 : f32
    %7 = vector.broadcast %cst_7 : f32 to vector<32x128xf32>
    %8 = arith.maximumf %6, %7 : vector<32x128xf32>
    %9 = arith.truncf %8 : vector<32x128xf32> to vector<32x128xbf16>
    %c0_8 = arith.constant 0 : index
    %c0_9 = arith.constant 0 : index
    %c0_10 = arith.constant 0 : index
    %10 = vector.load %arg4[%c0_8, %c0_9, %c0_10] : memref<4x128x256xbf16, #tpu.memory_space<vmem>>, vector<1x128x256xbf16>
    %11 = vector.shape_cast %10 : vector<1x128x256xbf16> to vector<128x256xbf16>
    %cst_11 = arith.constant dense<0.000000e+00> : vector<32x256xf32>
    %12 = tpu.matmul %9, %11, %cst_11 {dimension_numbers = #tpu.dot_dimension_numbers<[1], [0], [0], [1], [0, 0, 1, 1], [], []>} : vector<32x128xbf16>, vector<128x256xbf16>, vector<32x256xf32> -> vector<32x256xf32>
    %c0_12 = arith.constant 0 : index
    %c0_13 = arith.constant 0 : index
    %c0_14 = arith.constant 0 : index
    %13 = vector.load %arg5[%c0_12, %c0_13, %c0_14] : memref<4x1x256xf32, #tpu.memory_space<vmem>>, vector<1x1x256xf32>
    %14 = vector.shape_cast %13 : vector<1x1x256xf32> to vector<1x256xf32>
    %15 = vector.broadcast %14 : vector<1x256xf32> to vector<32x256xf32>
    %16 = arith.addf %12, %15 : vector<32x256xf32>
    %17 = vector.extract_strided_slice %16 {offsets = [0, 0], sizes = [32, 128], strides = [1, 1]} : vector<32x256xf32> to vector<32x128xf32>
    %18 = vector.extract_strided_slice %16 {offsets = [0, 128], sizes = [32, 128], strides = [1, 1]} : vector<32x256xf32> to vector<32x128xf32>
    %19 = arith.truncf %17 : vector<32x128xf32> to vector<32x128xbf16>
    %cst_15 = arith.constant dense<0.000000e+00> : vector<32x128xf32>
    %20 = tpu.matmul %0, %19, %cst_15 {dimension_numbers = #tpu.dot_dimension_numbers<[1], [0], [0], [1], [0, 0, 1, 1], [], []>} : vector<32x32xbf16>, vector<32x128xbf16>, vector<32x128xf32> -> vector<32x128xf32>
    %cst_16 = arith.constant 0.000000e+00 : f32
    %21 = vector.broadcast %cst_16 : f32 to vector<32x128xf32>
    %22 = arith.maximumf %20, %21 : vector<32x128xf32>
    %23 = arith.addf %22, %18 : vector<32x128xf32>
    %24 = arith.truncf %23 : vector<32x128xf32> to vector<32x128xbf16>
    %c1 = arith.constant 1 : index
    %c0_17 = arith.constant 0 : index
    %c0_18 = arith.constant 0 : index
    %25 = vector.load %arg4[%c1, %c0_17, %c0_18] : memref<4x128x256xbf16, #tpu.memory_space<vmem>>, vector<1x128x256xbf16>
    %26 = vector.shape_cast %25 : vector<1x128x256xbf16> to vector<128x256xbf16>
    %cst_19 = arith.constant dense<0.000000e+00> : vector<32x256xf32>
    %27 = tpu.matmul %24, %26, %cst_19 {dimension_numbers = #tpu.dot_dimension_numbers<[1], [0], [0], [1], [0, 0, 1, 1], [], []>} : vector<32x128xbf16>, vector<128x256xbf16>, vector<32x256xf32> -> vector<32x256xf32>
    %c1_20 = arith.constant 1 : index
    %c0_21 = arith.constant 0 : index
    %c0_22 = arith.constant 0 : index
    %28 = vector.load %arg5[%c1_20, %c0_21, %c0_22] : memref<4x1x256xf32, #tpu.memory_space<vmem>>, vector<1x1x256xf32>
    %29 = vector.shape_cast %28 : vector<1x1x256xf32> to vector<1x256xf32>
    %30 = vector.broadcast %29 : vector<1x256xf32> to vector<32x256xf32>
    %31 = arith.addf %27, %30 : vector<32x256xf32>
    %32 = vector.extract_strided_slice %31 {offsets = [0, 0], sizes = [32, 128], strides = [1, 1]} : vector<32x256xf32> to vector<32x128xf32>
    %33 = vector.extract_strided_slice %31 {offsets = [0, 128], sizes = [32, 128], strides = [1, 1]} : vector<32x256xf32> to vector<32x128xf32>
    %34 = arith.truncf %32 : vector<32x128xf32> to vector<32x128xbf16>
    %cst_23 = arith.constant dense<0.000000e+00> : vector<32x128xf32>
    %35 = tpu.matmul %0, %34, %cst_23 {dimension_numbers = #tpu.dot_dimension_numbers<[1], [0], [0], [1], [0, 0, 1, 1], [], []>} : vector<32x32xbf16>, vector<32x128xbf16>, vector<32x128xf32> -> vector<32x128xf32>
    %cst_24 = arith.constant 0.000000e+00 : f32
    %36 = vector.broadcast %cst_24 : f32 to vector<32x128xf32>
    %37 = arith.maximumf %35, %36 : vector<32x128xf32>
    %38 = arith.addf %37, %33 : vector<32x128xf32>
    %39 = arith.truncf %38 : vector<32x128xf32> to vector<32x128xbf16>
    %c2 = arith.constant 2 : index
    %c0_25 = arith.constant 0 : index
    %c0_26 = arith.constant 0 : index
    %40 = vector.load %arg4[%c2, %c0_25, %c0_26] : memref<4x128x256xbf16, #tpu.memory_space<vmem>>, vector<1x128x256xbf16>
    %41 = vector.shape_cast %40 : vector<1x128x256xbf16> to vector<128x256xbf16>
    %cst_27 = arith.constant dense<0.000000e+00> : vector<32x256xf32>
    %42 = tpu.matmul %39, %41, %cst_27 {dimension_numbers = #tpu.dot_dimension_numbers<[1], [0], [0], [1], [0, 0, 1, 1], [], []>} : vector<32x128xbf16>, vector<128x256xbf16>, vector<32x256xf32> -> vector<32x256xf32>
    %c2_28 = arith.constant 2 : index
    %c0_29 = arith.constant 0 : index
    %c0_30 = arith.constant 0 : index
    %43 = vector.load %arg5[%c2_28, %c0_29, %c0_30] : memref<4x1x256xf32, #tpu.memory_space<vmem>>, vector<1x1x256xf32>
    %44 = vector.shape_cast %43 : vector<1x1x256xf32> to vector<1x256xf32>
    %45 = vector.broadcast %44 : vector<1x256xf32> to vector<32x256xf32>
    %46 = arith.addf %42, %45 : vector<32x256xf32>
    %47 = vector.extract_strided_slice %46 {offsets = [0, 0], sizes = [32, 128], strides = [1, 1]} : vector<32x256xf32> to vector<32x128xf32>
    %48 = vector.extract_strided_slice %46 {offsets = [0, 128], sizes = [32, 128], strides = [1, 1]} : vector<32x256xf32> to vector<32x128xf32>
    %49 = arith.truncf %47 : vector<32x128xf32> to vector<32x128xbf16>
    %cst_31 = arith.constant dense<0.000000e+00> : vector<32x128xf32>
    %50 = tpu.matmul %0, %49, %cst_31 {dimension_numbers = #tpu.dot_dimension_numbers<[1], [0], [0], [1], [0, 0, 1, 1], [], []>} : vector<32x32xbf16>, vector<32x128xbf16>, vector<32x128xf32> -> vector<32x128xf32>
    %cst_32 = arith.constant 0.000000e+00 : f32
    %51 = vector.broadcast %cst_32 : f32 to vector<32x128xf32>
    %52 = arith.maximumf %50, %51 : vector<32x128xf32>
    %53 = arith.addf %52, %48 : vector<32x128xf32>
    %54 = arith.truncf %53 : vector<32x128xf32> to vector<32x128xbf16>
    %c3 = arith.constant 3 : index
    %c0_33 = arith.constant 0 : index
    %c0_34 = arith.constant 0 : index
    %55 = vector.load %arg4[%c3, %c0_33, %c0_34] : memref<4x128x256xbf16, #tpu.memory_space<vmem>>, vector<1x128x256xbf16>
    %56 = vector.shape_cast %55 : vector<1x128x256xbf16> to vector<128x256xbf16>
    %cst_35 = arith.constant dense<0.000000e+00> : vector<32x256xf32>
    %57 = tpu.matmul %54, %56, %cst_35 {dimension_numbers = #tpu.dot_dimension_numbers<[1], [0], [0], [1], [0, 0, 1, 1], [], []>} : vector<32x128xbf16>, vector<128x256xbf16>, vector<32x256xf32> -> vector<32x256xf32>
    %c3_36 = arith.constant 3 : index
    %c0_37 = arith.constant 0 : index
    %c0_38 = arith.constant 0 : index
    %58 = vector.load %arg5[%c3_36, %c0_37, %c0_38] : memref<4x1x256xf32, #tpu.memory_space<vmem>>, vector<1x1x256xf32>
    %59 = vector.shape_cast %58 : vector<1x1x256xf32> to vector<1x256xf32>
    %60 = vector.broadcast %59 : vector<1x256xf32> to vector<32x256xf32>
    %61 = arith.addf %57, %60 : vector<32x256xf32>
    %62 = vector.extract_strided_slice %61 {offsets = [0, 0], sizes = [32, 128], strides = [1, 1]} : vector<32x256xf32> to vector<32x128xf32>
    %63 = vector.extract_strided_slice %61 {offsets = [0, 128], sizes = [32, 128], strides = [1, 1]} : vector<32x256xf32> to vector<32x128xf32>
    %64 = arith.truncf %62 : vector<32x128xf32> to vector<32x128xbf16>
    %cst_39 = arith.constant dense<0.000000e+00> : vector<32x128xf32>
    %65 = tpu.matmul %0, %64, %cst_39 {dimension_numbers = #tpu.dot_dimension_numbers<[1], [0], [0], [1], [0, 0, 1, 1], [], []>} : vector<32x32xbf16>, vector<32x128xbf16>, vector<32x128xf32> -> vector<32x128xf32>
    %cst_40 = arith.constant 0.000000e+00 : f32
    %66 = vector.broadcast %cst_40 : f32 to vector<32x128xf32>
    %67 = arith.maximumf %65, %66 : vector<32x128xf32>
    %68 = arith.addf %67, %63 : vector<32x128xf32>
    %c0_41 = arith.constant 0 : index
    %c0_42 = arith.constant 0 : index
    %69 = vector.load %arg6[%c0_41, %c0_42] : memref<1x128xf32, #tpu.memory_space<vmem>>, vector<1x128xf32>
    %70 = vector.broadcast %69 : vector<1x128xf32> to vector<32x128xf32>
    %71 = arith.mulf %68, %70 : vector<32x128xf32>
    %cst_43 = arith.constant dense<0.000000e+00> : vector<32xf32>
    %72 = vector.multi_reduction <add>, %71, %cst_43 [1] : vector<32x128xf32> to vector<32xf32>
    %73 = vector.shape_cast %72 : vector<32xf32> to vector<32x1xf32>
    %c0_44 = arith.constant 0 : index
    %c0_45 = arith.constant 0 : index
    %74 = vector.load %arg7[%c0_44, %c0_45] : memref<1x1xf32, #tpu.memory_space<vmem>>, vector<1x1xf32>
    %75 = vector.broadcast %74 : vector<1x1xf32> to vector<32x1xf32>
    %76 = arith.addf %73, %75 : vector<32x1xf32>
    %77 = arith.negf %76 : vector<32x1xf32>
    %78 = math.exp %77 : vector<32x1xf32>
    %cst_46 = arith.constant 1.000000e+00 : f32
    %79 = vector.broadcast %cst_46 : f32 to vector<32x1xf32>
    %80 = arith.addf %79, %78 : vector<32x1xf32>
    %81 = arith.divf %79, %80 : vector<32x1xf32>
    %c0_47 = arith.constant 0 : index
    %c0_48 = arith.constant 0 : index
    %82 = vector.load %arg8[%c0_47, %c0_48] : memref<32x1xf32, #tpu.memory_space<vmem>>, vector<32x1xf32>
    tpu.vector_store %arg8[%c0_47, %c0_48], %81 {strides = array<i32>} : memref<32x1xf32, #tpu.memory_space<vmem>>, vector<32x1xf32>,
    return
  }
}

</mosaic_0001>

<bundles_post_ra>
// kernel: tpu_custom_call.1
= control target key start
LH: loop header
LB: loop body
LE: loop exit
PB: predicated region body
PF: predicated region fallthrough
CT: control target
= control target key end

     0   :  { %s1582_s0 = inlined_call_operand.vmem [shape: bf16[32,8], index: 0, kind: input, shape index: {}]   ;;  %s1583_s1 = inlined_call_operand.vmem [shape: bf16[32,32], index: 1, kind: input, shape index: {}]   ;;  %s1584_s2 = inlined_call_operand.hbm [shape: bf16[8,128], index: 2, kind: input, shape index: {}]   ;;  %s1585_s3 = inlined_call_operand.vmem [shape: f32[1,128], index: 3, kind: input, shape index: {}]   ;;  %s1586_s4 = inlined_call_operand.hbm [shape: bf16[4,128,256], index: 4, kind: input, shape index: {}]   ;;  %s1587_s5 = inlined_call_operand.vmem [shape: f32[4,1,256], index: 5, kind: input, shape index: {}]   ;;  %s1588_s6 = inlined_call_operand.vmem [shape: f32[1,128], index: 6, kind: input, shape index: {}]   ;;  %s1589_s7 = inlined_call_operand.<no memory space> [shape: f32[1,1], index: 7, kind: input, shape index: {}]   ;;  %s1590_s8 = inlined_call_operand.vmem [shape: f32[32,1], index: 8, kind: output, shape index: {}]  }
   0x1   :  { %v13_v0 = vstv %s1589_s7 }
   0x2   :  { %14 = vst [vmem:[#allocation2] sm:$0x1] %v13_v0 }
   0x3   :  { %15 = vsyncpa [#allocation4], 0 }
   0x4   :  { %16 = vsyncpa [#allocation6], 0  ;;  %s1435_s29 = smov [#allocation3]   ;;  %s1436_s9 = smov [#allocation5]  }
   0x5   :  { %s27_s30 = sshll.u32 %s1435_s29, 4  ;;  %s38_s10 = sshll.u32 %s1436_s9, 4  ;;  %s28_s30 = int_to_ptr.vmem [resolvable:$true] %s27_s30  ;;  %s39_s10 = int_to_ptr.vmem [resolvable:$true] %s38_s10 }
   0x6   :  { %s1399_s11 = scalar_lea.vmem %s28_s30, 64  ;;  %p1404_p1 = scmp.lt.s32.totalorder %s28_s30, %s28_s30 }
   0x7   :  { %p1400_p0 = scmp.ne.s32.totalorder %s28_s30, %s1399_s11  ;;  %p1405_p2 = scmp.lt.s32.totalorder %s1399_s11, %s1399_s11 }
   0x9   :  { %p1406_p3 = por %p1405_p2, %p1404_p1 }
   0xb   :  { %p1407_p4 = pnand %p1406_p3, %p1400_p0 }
   0xd   :  { %1410 = shalt.err (!%p1407_p4)
}
   0xe   :  { %30 = dma.hbm_to_vmem [thread:$0]  %s1584_s2, 64, %s28_s30, [#allocation4]  }
   0xf   :  { %s1419_s7 = scalar_lea.vmem %s39_s10, 8192  ;;  %p1424_p6 = scmp.lt.s32.totalorder %s39_s10, %s39_s10 }
  0x10   :  { %p1420_p5 = scmp.ne.s32.totalorder %s39_s10, %s1419_s7  ;;  %p1425_p7 = scmp.lt.s32.totalorder %s1419_s7, %s1419_s7 }
  0x12   :  { %p1426_p8 = por %p1425_p7, %p1424_p6 }
  0x14   :  { %p1427_p9 = pnand %p1426_p8, %p1420_p5 }
  0x16   :  { %1430 = shalt.err (!%p1427_p9)
}
  0x17   :  { %s1437_s14 = smov 128   ;;  %s1438_s15 = smov 8  }
  0x18   :  { %44 = dma.hbm_to_vmem [thread:$0]  %s1586_s4, 8192, %s39_s10, [#allocation6], %s1437_s14, %s1437_s14, %s1438_s15  }
  0x19   :  { %1431 = dma.done.wait [#allocation4], 64  }
  0x1a   :  { %1432 = vsyncadd [#allocation4], 4294967232 }
  0x1b   :  { %1433 = dma.done.wait [#allocation6], 8192  }
  0x1c   :  { %1434 = vsyncadd [#allocation6], 4294959104  ;;  %vm91_vm0 = vcmask 1043456   ;;  %vm84_vm1 = vcmask 64512   ;;  %v66_v1 = vld [vmem:[#allocation3] sm:$0xf]  ;;  %v168_v38 = vlaneseq }
  0x1d   :  { %1269 = vmatprep.subr.msk.bf16.mxu0 %vm91_vm0, %v66_v1  ;;  %v93_v2 = vsel %vm91_vm0, %v66_v1, 0  ;;  %v1275_v3 = vld [vmem:[%s1582_s0] sm:$0xff]   ;;  %v1276_v4 = vld [vmem:[%s1582_s0 + $0x8] sm:$0xff]   ;;  %v1439_v21 = vmov 0   ;;  %vm323_vm2 = vcmask 261120   ;;  %vm1113_vm3 = vcmask 7168  }
  0x1e   :  { %1232 = vmatpush3.bf16.msra.mxu0 %v93_v2  ;;  %1233 = vmatprep.mubr.msk.bf16.mxu0 %vm84_vm1, %v1275_v3  ;;  %v1277_v5 = vld [vmem:[#allocation5 + $0x74] ss:$8 sps:$4 sm:$0xff]   ;;  %v1279_v6 = vld [vmem:[#allocation5 + $0x70] ss:$8 sps:$4 sm:$0xff]   ;;  %v1280_v7 = vld [vmem:[#allocation5 + $0x64] ss:$8 sps:$4 sm:$0xff]  }
  0x1f   :  { %258 = vmatprep.subr.bf16.mxu1 %v1277_v5  ;;  %v1282_v8 = vld [vmem:[#allocation5 + $0x60] ss:$8 sps:$4 sm:$0xff]   ;;  %v1283_v9 = vld [vmem:[#allocation5 + $0x54] ss:$8 sps:$4 sm:$0xff]   ;;  %v1285_v10 = vld [vmem:[#allocation5 + $0x50] ss:$8 sps:$4 sm:$0xff]   ;;  %290 = vmatprep.mubr.bf16.mxu1 %v1439_v21 }
  0x20   :  { %259 = vmatpush1.bf16.msra.mxu1 %v1279_v6  ;;  %v1286_v11 = vld [vmem:[#allocation5 + $0x44] ss:$8 sps:$4 sm:$0xff]   ;;  %v1288_v12 = vld [vmem:[#allocation5 + $0x40] ss:$8 sps:$4 sm:$0xff]   ;;  %v1289_v13 = vld [vmem:[#allocation5 + $0x34] ss:$8 sps:$4 sm:$0xff]  }
  0x21   :  { %1234 = vmatmul.mubr.msk.bf16.vlgmr.msra.gmra.mxu0 %vm84_vm1, %v1276_v4  ;;  %260 = vmatprep.subr.bf16.mxu1 %v1280_v7  ;;  %v1291_v14 = vld [vmem:[#allocation5 + $0x30] ss:$8 sps:$4 sm:$0xff]   ;;  %v1292_v15 = vld [vmem:[#allocation5 + $0x24] ss:$8 sps:$4 sm:$0xff]   ;;  %v1294_v16 = vld [vmem:[#allocation5 + $0x20] ss:$8 sps:$4 sm:$0xff]  }
  0x22   :  { %v1295_v17 = vld [vmem:[#allocation5 + $0x14] ss:$8 sps:$4 sm:$0xff]   ;;  %v1297_v18 = vld [vmem:[#allocation5 + $0x10] ss:$8 sps:$4 sm:$0xff]   ;;  %v1298_v19 = vld [vmem:[#allocation5 + $0x4] ss:$8 sps:$4 sm:$0xff]  }
  0x23   :  { %v1300_v20 = vld [vmem:[#allocation5] ss:$8 sps:$4 sm:$0xff]   ;;  %v1124_v24 = vld [vmem:[%s1585_s3] ss:$0 sm:$0xff]  ;;  %v169_v41 = vshrl.u32 %v168_v38, 7 }
  0x24   :  { %261 = vmatpush1.bf16.msra.mxu1 %v1282_v8  ;;  %v1508_v37 = vld [vmem:[%s1583_s1] sm:$0xff]   ;;  %v1525_v57 = vld [vmem:[%s1583_s1 + $0x8] sm:$0xff]  }
  0x25   :  { %262 = vmatprep.subr.bf16.mxu1 %v1283_v9  ;;  %1241 = vmatprep.mubr.msk.bf16.mxu0 %vm323_vm2, %v1508_v37  ;;  %v1514_v44 = vsub.s32 0, %v169_v41  ;;  %v166_v45 = vld [vmem:[%s1587_s5] sm:$0x3]  ;;  %v1308_v59 = vld [vmem:[#allocation5 + $0xe4] ss:$8 sps:$4 sm:$0xff]   ;;  %v1530_v9 = vsub.s32 1, %v169_v41 }
  0x26   :  { %v1305_v56 = vld [vmem:[#allocation5 + $0xf4] ss:$8 sps:$4 sm:$0xff]   ;;  %v1303_v58 = vld [vmem:[#allocation5 + $0xf0] ss:$8 sps:$4 sm:$0xff]   ;;  %v1306_v60 = vld [vmem:[#allocation5 + $0xe0] ss:$8 sps:$4 sm:$0xff]  }
  0x27   :  { %v171_v48 = vrot.slane %v166_v45, %v1514_v44  ;;  %v1311_v61 = vld [vmem:[#allocation5 + $0xd4] ss:$8 sps:$4 sm:$0xff]   ;;  %v1309_v62 = vld [vmem:[#allocation5 + $0xd0] ss:$8 sps:$4 sm:$0xff]   ;;  %v1314_v63 = vld [vmem:[#allocation5 + $0xc4] ss:$8 sps:$4 sm:$0xff]  }
  0x28   :  { %263 = vmatpush1.bf16.msra.mxu1 %v1285_v10  ;;  %v1312_v0 = vld [vmem:[#allocation5 + $0xc0] ss:$8 sps:$4 sm:$0xff]   ;;  %v1317_v1 = vld [vmem:[#allocation5 + $0xb4] ss:$8 sps:$4 sm:$0xff]   ;;  %v1315_v2 = vld [vmem:[#allocation5 + $0xb0] ss:$8 sps:$4 sm:$0xff]  }
  0x29   :  { %264 = vmatprep.subr.bf16.mxu1 %v1286_v11  ;;  %v1320_v3 = vld [vmem:[#allocation5 + $0xa4] ss:$8 sps:$4 sm:$0xff]   ;;  %v1318_v4 = vld [vmem:[#allocation5 + $0xa0] ss:$8 sps:$4 sm:$0xff]   ;;  %v1323_v5 = vld [vmem:[#allocation5 + $0x94] ss:$8 sps:$4 sm:$0xff]  }
  0x2a   :  { %v1321_v6 = vld [vmem:[#allocation5 + $0x90] ss:$8 sps:$4 sm:$0xff]   ;;  %v1326_v7 = vld [vmem:[#allocation5 + $0x84] ss:$8 sps:$4 sm:$0xff]   ;;  %v1324_v8 = vld [vmem:[#allocation5 + $0x80] ss:$8 sps:$4 sm:$0xff]  }
  0x2b   :  { %v1338_v38 = vld [vmem:[#allocation5 + $0x144] ss:$8 sps:$4 sm:$0xff]   ;;  %v1339_v41 = vld [vmem:[#allocation5 + $0x130] ss:$8 sps:$4 sm:$0xff]  }
  0x2c   :  { %265 = vmatpush1.bf16.msra.mxu1 %v1288_v12  ;;  %v175_v12 = vrot.slane %v166_v45, %v1530_v9 }
  0x2d   :  { %266 = vmatprep.subr.bf16.mxu1 %v1289_v13 }
  0x30   :  { %267 = vmatpush1.bf16.msra.mxu1 %v1291_v14 }
  0x31   :  { %268 = vmatprep.subr.bf16.mxu1 %v1292_v15 }
  0x34   :  { %269 = vmatpush1.bf16.msra.mxu1 %v1294_v16 }
  0x35   :  { %270 = vmatprep.subr.bf16.mxu1 %v1295_v17 }
  0x38   :  { %271 = vmatpush1.bf16.msra.mxu1 %v1297_v18 }
  0x39   :  { %272 = vmatprep.subr.bf16.mxu1 %v1298_v19 }
  0x3c   :  { %273 = vmatpush1.bf16.msra.mxu1 %v1300_v20 }
  0xe1   :  { %v1235_v22 = vpop.f32.mrf.mxu0 }
  0xe2   :  { %v138_v33 = vadd.f32 %v1235_v22, %v1124_v24 }
  0xe3   :  { %v129_v23 = vpop.f32.mrf.mxu0 }
  0xe4   :  { %v130_v26 = vadd.f32 %v1124_v24, %v129_v23  ;;  %v146_v35 = vmax.f32 %v138_v33, 0.0  ;;  %v1332_v33 = vld [vmem:[#allocation5 + $0x164] ss:$8 sps:$4 sm:$0xff]  }
  0xe5   :  { %v1236_v25 = vpop.f32.mrf.mxu0 }
  0xe6   :  { %v144_v29 = vmax.f32 %v130_v26, 0.0  ;;  %v141_v31 = vadd.f32 %v1236_v25, %v1124_v24 }
  0xe7   :  { %v132_v27 = vpop.f32.mrf.mxu0 }
  0xe8   :  { %v133_v28 = vadd.f32 %v1124_v24, %v132_v27  ;;  %v147_v34 = vmax.f32 %v141_v31, 0.0  ;;  %v1327_v31 = vld [vmem:[#allocation5 + $0x170] ss:$8 sps:$4 sm:$0xff]  }
  0xea   :  { %v145_v30 = vmax.f32 %v133_v28, 0.0  ;;  %v149_v36 = vpack.c.bf16 %v147_v34, %v146_v35  ;;  %v1330_v34 = vld [vmem:[#allocation5 + $0x160] ss:$8 sps:$4 sm:$0xff]   ;;  %v1335_v35 = vld [vmem:[#allocation5 + $0x154] ss:$8 sps:$4 sm:$0xff]  }
  0xec   :  { %v148_v32 = vpack.c.bf16 %v145_v30, %v144_v29 }
  0xee   :  { %291 = vmatmul.mubr.bf16.vlgmr.msra.gmra.mxu1 %v148_v32  ;;  %v1329_v32 = vld [vmem:[#allocation5 + $0x174] ss:$8 sps:$4 sm:$0xff]  }
  0xef   :  { %300 = vmatprep.mubr.bf16.mxu1 %v1439_v21 }
  0xf6   :  { %301 = vmatmul.mubr.bf16.gmra.mxu1 %v149_v36  ;;  %v1333_v36 = vld [vmem:[#allocation5 + $0x150] ss:$8 sps:$4 sm:$0xff]  }
  0xf7   :  { %1249 = vmatprep.mubr.msk.bf16.mxu1 %vm323_vm2, %v1508_v37 }
 0x1ae   :  { %v292_v39 = vpop.f32.mrf.mxu1 }
 0x1af   :  { %v293_v53 = vadd.f32 %v292_v39, %v171_v48  ;;  %v1336_v39 = vld [vmem:[#allocation5 + $0x140] ss:$8 sps:$4 sm:$0xff]  }
 0x1b0   :  { %v294_v40 = vpop.f32.mrf.mxu1 }
 0x1b1   :  { %v295_v16 = vadd.f32 %v294_v40, %v175_v12  ;;  %v1341_v40 = vld [vmem:[#allocation5 + $0x134] ss:$8 sps:$4 sm:$0xff]  }
 0x1b2   :  { %v296_v42 = vpop.f32.mrf.mxu1 }
 0x1b3   :  { %v297_v50 = vadd.f32 %v296_v42, %v171_v48 }
 0x1b4   :  { %v298_v43 = vpop.f32.mrf.mxu1 }
 0x1b5   :  { %v311_v55 = vpack.c.bf16 %v297_v50, %v293_v53  ;;  %v299_v17 = vadd.f32 %v298_v43, %v175_v12 }
 0x1b6   :  { %v302_v46 = vpop.f32.mrf.mxu1 }
 0x1b7   :  { %v303_v51 = vadd.f32 %v302_v46, %v171_v48 }
 0x1b8   :  { %v1519_v47 = vpop.f32.mrf.mxu1 }
 0x1b9   :  { %v305_v27 = vadd.f32 %v1519_v47, %v175_v12  ;;  %v1149_v47 = vld [vmem:[%s1587_s5 + $0x2] sm:$0x3] }
 0x1ba   :  { %v306_v49 = vpop.f32.mrf.mxu1  ;;  %v412_v50 = vrot.slane %v1149_v47, %v1514_v44 }
 0x1bb   :  { %v307_v52 = vadd.f32 %v306_v49, %v171_v48 }
 0x1bc   :  { %v308_v22 = vpop.f32.mrf.mxu1 }
 0x1bd   :  { %v312_v54 = vpack.c.bf16 %v307_v52, %v303_v51  ;;  %v309_v25 = vadd.f32 %v308_v22, %v175_v12 }
 0x1bf   :  { %1237 = vmatprep.subr.bf16.mxu0 %v312_v54 }
 0x1c0   :  { %1238 = vmatpush3.bf16.msra.mxu0 %v312_v54 }
 0x1c1   :  { %1239 = vmatprep.subr.bf16.mxu0 %v311_v55 }
 0x1c4   :  { %1240 = vmatpush3.bf16.msra.mxu0 %v311_v55 }
 0x1c5   :  { %499 = vmatprep.subr.bf16.mxu0 %v1305_v56 }
 0x1c7   :  { %1242 = vmatmul.mubr.msk.bf16.vlgmr.msra.gmra.mxu0 %vm323_vm2, %v1525_v57 }
 0x1c8   :  { %500 = vmatpush1.bf16.msra.mxu0 %v1303_v58  ;;  %531 = vmatprep.mubr.bf16.mxu0 %v1439_v21 }
 0x1c9   :  { %501 = vmatprep.subr.bf16.mxu0 %v1308_v59  ;;  %v1344_v59 = vld [vmem:[#allocation5 + $0x124] ss:$8 sps:$4 sm:$0xff]  }
 0x1cc   :  { %502 = vmatpush1.bf16.msra.mxu0 %v1306_v60  ;;  %v1342_v60 = vld [vmem:[#allocation5 + $0x120] ss:$8 sps:$4 sm:$0xff]  }
 0x1cd   :  { %503 = vmatprep.subr.bf16.mxu0 %v1311_v61  ;;  %v1347_v61 = vld [vmem:[#allocation5 + $0x114] ss:$8 sps:$4 sm:$0xff]  }
 0x1d0   :  { %504 = vmatpush1.bf16.msra.mxu0 %v1309_v62  ;;  %v1345_v62 = vld [vmem:[#allocation5 + $0x110] ss:$8 sps:$4 sm:$0xff]  }
 0x1d1   :  { %505 = vmatprep.subr.bf16.mxu0 %v1314_v63  ;;  %v1350_v63 = vld [vmem:[#allocation5 + $0x104] ss:$8 sps:$4 sm:$0xff]  }
 0x1d4   :  { %506 = vmatpush1.bf16.msra.mxu0 %v1312_v0  ;;  %v1348_v0 = vld [vmem:[#allocation5 + $0x100] ss:$8 sps:$4 sm:$0xff]  }
 0x1d5   :  { %507 = vmatprep.subr.bf16.mxu0 %v1317_v1 }
 0x1d8   :  { %508 = vmatpush1.bf16.msra.mxu0 %v1315_v2 }
 0x1d9   :  { %509 = vmatprep.subr.bf16.mxu0 %v1320_v3  ;;  %v416_v3 = vrot.slane %v1149_v47, %v1530_v9  ;;  %v1365_v47 = vld [vmem:[#allocation5 + $0x1b4] ss:$8 sps:$4 sm:$0xff]  }
 0x1dc   :  { %510 = vmatpush1.bf16.msra.mxu0 %v1318_v4 }
 0x1dd   :  { %511 = vmatprep.subr.bf16.mxu0 %v1323_v5 }
 0x1e0   :  { %512 = vmatpush1.bf16.msra.mxu0 %v1321_v6 }
 0x1e1   :  { %513 = vmatprep.subr.bf16.mxu0 %v1326_v7 }
 0x1e4   :  { %514 = vmatpush1.bf16.msra.mxu0 %v1324_v8 }
 0x1e5   :  { %723 = vmatprep.subr.bf16.mxu0 %v1329_v32 }
 0x287   :  { %v1243_v10 = vpop.f32.mrf.mxu0 }
 0x288   :  { %v381_v26 = vmax.f32 %v1243_v10, 0.0 }
 0x289   :  { %v364_v11 = vpop.f32.mrf.mxu0 }
 0x28a   :  { %v379_v14 = vmax.f32 %v364_v11, 0.0  ;;  %v385_v29 = vadd.f32 %v381_v26, %v305_v27  ;;  %v1168_v27 = vld [vmem:[%s1587_s5 + $0x4] sm:$0x3] }
 0x28b   :  { %v1244_v13 = vpop.f32.mrf.mxu0 }
 0x28c   :  { %v383_v19 = vadd.f32 %v379_v14, %v295_v16  ;;  %v382_v23 = vmax.f32 %v1244_v13, 0.0 }
 0x28d   :  { %v367_v15 = vpop.f32.mrf.mxu0 }
 0x28e   :  { %v380_v18 = vmax.f32 %v367_v15, 0.0  ;;  %v386_v28 = vadd.f32 %v382_v23, %v309_v25 }
 0x290   :  { %v384_v20 = vadd.f32 %v380_v18, %v299_v17  ;;  %v388_v30 = vpack.c.bf16 %v386_v28, %v385_v29 }
 0x292   :  { %v387_v24 = vpack.c.bf16 %v384_v20, %v383_v19 }
 0x294   :  { %532 = vmatmul.mubr.bf16.vlgmr.msra.gmra.mxu0 %v387_v24 }
 0x295   :  { %541 = vmatprep.mubr.bf16.mxu0 %v1439_v21  ;;  %724 = vmatpush1.bf16.msra.mxu0 %v1327_v31 }
 0x296   :  { %725 = vmatprep.subr.bf16.mxu0 %v1332_v33 }
 0x299   :  { %726 = vmatpush1.bf16.msra.mxu0 %v1330_v34 }
 0x29a   :  { %727 = vmatprep.subr.bf16.mxu0 %v1335_v35 }
 0x29c   :  { %542 = vmatmul.mubr.bf16.gmra.mxu0 %v388_v30  ;;  %v636_v30 = vrot.slane %v1168_v27, %v1514_v44 }
 0x29d   :  { %755 = vmatprep.mubr.bf16.mxu0 %v1439_v21  ;;  %728 = vmatpush1.bf16.msra.mxu0 %v1333_v36 }
 0x29e   :  { %729 = vmatprep.subr.bf16.mxu0 %v1338_v38  ;;  %v1353_v38 = vld [vmem:[#allocation5 + $0x1f4] ss:$8 sps:$4 sm:$0xff]  }
 0x2a1   :  { %730 = vmatpush1.bf16.msra.mxu0 %v1336_v39  ;;  %v1351_v39 = vld [vmem:[#allocation5 + $0x1f0] ss:$8 sps:$4 sm:$0xff]  }
 0x2a2   :  { %731 = vmatprep.subr.bf16.mxu0 %v1341_v40  ;;  %v1356_v40 = vld [vmem:[#allocation5 + $0x1e4] ss:$8 sps:$4 sm:$0xff]  }
 0x2a5   :  { %732 = vmatpush1.bf16.msra.mxu0 %v1339_v41  ;;  %v1354_v41 = vld [vmem:[#allocation5 + $0x1e0] ss:$8 sps:$4 sm:$0xff]  }
 0x2a6   :  { %733 = vmatprep.subr.bf16.mxu0 %v1344_v59 }
 0x2a9   :  { %734 = vmatpush1.bf16.msra.mxu0 %v1342_v60 }
 0x2aa   :  { %735 = vmatprep.subr.bf16.mxu0 %v1347_v61 }
 0x2ad   :  { %736 = vmatpush1.bf16.msra.mxu0 %v1345_v62 }
 0x2ae   :  { %737 = vmatprep.subr.bf16.mxu0 %v1350_v63 }
 0x2b1   :  { %738 = vmatpush1.bf16.msra.mxu0 %v1348_v0 }
 0x354   :  { %v533_v42 = vpop.f32.mrf.mxu0 }
 0x355   :  { %v534_v55 = vadd.f32 %v533_v42, %v412_v50  ;;  %v1359_v42 = vld [vmem:[#allocation5 + $0x1d4] ss:$8 sps:$4 sm:$0xff]  }
 0x356   :  { %v535_v43 = vpop.f32.mrf.mxu0 }
 0x357   :  { %v536_v7 = vadd.f32 %v535_v43, %v416_v3  ;;  %v1357_v43 = vld [vmem:[#allocation5 + $0x1d0] ss:$8 sps:$4 sm:$0xff]  }
 0x358   :  { %v537_v45 = vpop.f32.mrf.mxu0 }
 0x359   :  { %v538_v52 = vadd.f32 %v537_v45, %v412_v50  ;;  %v1362_v45 = vld [vmem:[#allocation5 + $0x1c4] ss:$8 sps:$4 sm:$0xff]  }
 0x35a   :  { %v539_v46 = vpop.f32.mrf.mxu0 }
 0x35b   :  { %v552_v58 = vpack.c.bf16 %v538_v52, %v534_v55  ;;  %v540_v8 = vadd.f32 %v539_v46, %v416_v3  ;;  %v1360_v46 = vld [vmem:[#allocation5 + $0x1c0] ss:$8 sps:$4 sm:$0xff]   ;;  %v1369_v52 = vld [vmem:[#allocation5 + $0x190] ss:$8 sps:$4 sm:$0xff]  }
 0x35c   :  { %v543_v48 = vpop.f32.mrf.mxu0 }
 0x35d   :  { %v544_v53 = vadd.f32 %v543_v48, %v412_v50  ;;  %v1363_v48 = vld [vmem:[#allocation5 + $0x1b0] ss:$8 sps:$4 sm:$0xff]  }
 0x35e   :  { %v545_v49 = vpop.f32.mrf.mxu0 }
 0x35f   :  { %v546_v18 = vadd.f32 %v545_v49, %v416_v3  ;;  %v1368_v49 = vld [vmem:[#allocation5 + $0x1a4] ss:$8 sps:$4 sm:$0xff]  }
 0x360   :  { %v547_v51 = vpop.f32.mrf.mxu0 }
 0x361   :  { %v548_v54 = vadd.f32 %v547_v51, %v412_v50  ;;  %v1366_v50 = vld [vmem:[#allocation5 + $0x1a0] ss:$8 sps:$4 sm:$0xff]   ;;  %v1371_v51 = vld [vmem:[#allocation5 + $0x194] ss:$8 sps:$4 sm:$0xff]  }
 0x362   :  { %v549_v13 = vpop.f32.mrf.mxu0 }
 0x363   :  { %v553_v56 = vpack.c.bf16 %v548_v54, %v544_v53  ;;  %v550_v16 = vadd.f32 %v549_v13, %v416_v3  ;;  %v1374_v53 = vld [vmem:[#allocation5 + $0x184] ss:$8 sps:$4 sm:$0xff]   ;;  %v1372_v54 = vld [vmem:[#allocation5 + $0x180] ss:$8 sps:$4 sm:$0xff]  }
 0x365   :  { %1245 = vmatprep.subr.bf16.mxu1 %v553_v56 }
 0x366   :  { %1246 = vmatpush3.bf16.msra.mxu1 %v553_v56 }
 0x367   :  { %1247 = vmatprep.subr.bf16.mxu1 %v552_v58 }
 0x36a   :  { %1248 = vmatpush3.bf16.msra.mxu1 %v552_v58  ;;  %v640_v58 = vrot.slane %v1168_v27, %v1530_v9 }
 0x36d   :  { %1250 = vmatmul.mubr.msk.bf16.vlgmr.msra.gmra.mxu1 %vm323_vm2, %v1525_v57 }
 0x36e   :  { %1257 = vmatprep.mubr.msk.bf16.mxu1 %vm323_vm2, %v1508_v37 }
 0x42d   :  { %v1251_v1 = vpop.f32.mrf.mxu1 }
 0x42e   :  { %v605_v17 = vmax.f32 %v1251_v1, 0.0 }
 0x42f   :  { %v588_v2 = vpop.f32.mrf.mxu1 }
 0x430   :  { %v603_v5 = vmax.f32 %v588_v2, 0.0  ;;  %v609_v20 = vadd.f32 %v605_v17, %v546_v18  ;;  %v1187_v17 = vld [vmem:[%s1587_s5 + $0x6] sm:$0x3] }
 0x431   :  { %v1252_v4 = vpop.f32.mrf.mxu1 }
 0x432   :  { %v607_v11 = vadd.f32 %v603_v5, %v536_v7  ;;  %v606_v14 = vmax.f32 %v1252_v4, 0.0 }
 0x433   :  { %v591_v6 = vpop.f32.mrf.mxu1 }
 0x434   :  { %v604_v10 = vmax.f32 %v591_v6, 0.0  ;;  %v610_v19 = vadd.f32 %v606_v14, %v550_v16 }
 0x436   :  { %v608_v12 = vadd.f32 %v604_v10, %v540_v8  ;;  %v612_v22 = vpack.c.bf16 %v610_v19, %v609_v20  ;;  %v860_v20 = vrot.slane %v1187_v17, %v1514_v44 }
 0x438   :  { %v611_v15 = vpack.c.bf16 %v608_v12, %v607_v11 }
 0x43a   :  { %756 = vmatmul.mubr.bf16.vlgmr.msra.gmra.mxu0 %v611_v15 }
 0x43b   :  { %765 = vmatprep.mubr.bf16.mxu0 %v1439_v21 }
 0x442   :  { %766 = vmatmul.mubr.bf16.gmra.mxu0 %v612_v22 }
 0x443   :  { %1265 = vmatprep.mubr.msk.bf16.mxu0 %vm323_vm2, %v1508_v37 }
 0x4fa   :  { %v757_v23 = vpop.f32.mrf.mxu0 }
 0x4fb   :  { %v758_v35 = vadd.f32 %v757_v23, %v636_v30 }
 0x4fc   :  { %v759_v24 = vpop.f32.mrf.mxu0 }
 0x4fd   :  { %v760_v62 = vadd.f32 %v759_v24, %v640_v58 }
 0x4fe   :  { %v761_v25 = vpop.f32.mrf.mxu0 }
 0x4ff   :  { %v762_v32 = vadd.f32 %v761_v25, %v636_v30 }
 0x500   :  { %v763_v26 = vpop.f32.mrf.mxu0 }
 0x501   :  { %v776_v37 = vpack.c.bf16 %v762_v32, %v758_v35  ;;  %v764_v63 = vadd.f32 %v763_v26, %v640_v58 }
 0x502   :  { %v767_v28 = vpop.f32.mrf.mxu0 }
 0x503   :  { %v768_v33 = vadd.f32 %v767_v28, %v636_v30  ;;  %v864_v28 = vrot.slane %v1187_v17, %v1530_v9 }
 0x504   :  { %v1551_v29 = vpop.f32.mrf.mxu0 }
 0x505   :  { %v770_v8 = vadd.f32 %v1551_v29, %v640_v58 }
 0x506   :  { %v771_v31 = vpop.f32.mrf.mxu0 }
 0x507   :  { %v772_v34 = vadd.f32 %v771_v31, %v636_v30 }
 0x508   :  { %v773_v3 = vpop.f32.mrf.mxu0 }
 0x509   :  { %v777_v36 = vpack.c.bf16 %v772_v34, %v768_v33  ;;  %v774_v6 = vadd.f32 %v773_v3, %v640_v58  ;;  %v1206_v33 = vld [vmem:[%s1588_s6] ss:$0 sm:$0xff] }
 0x50b   :  { %1253 = vmatprep.subr.bf16.mxu1 %v777_v36 }
 0x50c   :  { %1254 = vmatpush3.bf16.msra.mxu1 %v777_v36 }
 0x50d   :  { %1255 = vmatprep.subr.bf16.mxu1 %v776_v37 }
 0x510   :  { %1256 = vmatpush3.bf16.msra.mxu1 %v776_v37 }
 0x511   :  { %947 = vmatprep.subr.bf16.mxu1 %v1353_v38 }
 0x513   :  { %1258 = vmatmul.mubr.msk.bf16.vlgmr.msra.gmra.mxu1 %vm323_vm2, %v1525_v57 }
 0x514   :  { %948 = vmatpush1.bf16.msra.mxu1 %v1351_v39  ;;  %979 = vmatprep.mubr.bf16.mxu1 %v1439_v21 }
 0x515   :  { %949 = vmatprep.subr.bf16.mxu1 %v1356_v40 }
 0x518   :  { %950 = vmatpush1.bf16.msra.mxu1 %v1354_v41 }
 0x519   :  { %951 = vmatprep.subr.bf16.mxu1 %v1359_v42 }
 0x51c   :  { %952 = vmatpush1.bf16.msra.mxu1 %v1357_v43 }
 0x51d   :  { %953 = vmatprep.subr.bf16.mxu1 %v1362_v45 }
 0x520   :  { %954 = vmatpush1.bf16.msra.mxu1 %v1360_v46 }
 0x521   :  { %955 = vmatprep.subr.bf16.mxu1 %v1365_v47 }
 0x524   :  { %956 = vmatpush1.bf16.msra.mxu1 %v1363_v48 }
 0x525   :  { %957 = vmatprep.subr.bf16.mxu1 %v1368_v49  ;;  %v1207_v49 = vld [vmem:[#allocation2] ss:$0 sm:$0xff] }
 0x528   :  { %958 = vmatpush1.bf16.msra.mxu1 %v1366_v50 }
 0x529   :  { %959 = vmatprep.subr.bf16.mxu1 %v1371_v51 }
 0x52c   :  { %960 = vmatpush1.bf16.msra.mxu1 %v1369_v52 }
 0x52d   :  { %961 = vmatprep.subr.bf16.mxu1 %v1374_v53 }
 0x530   :  { %962 = vmatpush1.bf16.msra.mxu1 %v1372_v54 }
 0x5d3   :  { %v1259_v55 = vpop.f32.mrf.mxu1 }
 0x5d4   :  { %v829_v7 = vmax.f32 %v1259_v55, 0.0 }
 0x5d5   :  { %v812_v56 = vpop.f32.mrf.mxu1 }
 0x5d6   :  { %v827_v60 = vmax.f32 %v812_v56, 0.0  ;;  %v833_v11 = vadd.f32 %v829_v7, %v770_v8 }
 0x5d7   :  { %v1260_v59 = vpop.f32.mrf.mxu1 }
 0x5d8   :  { %v831_v1 = vadd.f32 %v827_v60, %v760_v62  ;;  %v830_v4 = vmax.f32 %v1260_v59, 0.0 }
 0x5d9   :  { %v815_v61 = vpop.f32.mrf.mxu1 }
 0x5da   :  { %v828_v0 = vmax.f32 %v815_v61, 0.0  ;;  %v834_v10 = vadd.f32 %v830_v4, %v774_v6 }
 0x5dc   :  { %v832_v2 = vadd.f32 %v828_v0, %v764_v63  ;;  %v836_v12 = vpack.c.bf16 %v834_v10, %v833_v11 }
 0x5de   :  { %v835_v5 = vpack.c.bf16 %v832_v2, %v831_v1 }
 0x5e0   :  { %980 = vmatmul.mubr.bf16.vlgmr.msra.gmra.mxu1 %v835_v5 }
 0x5e1   :  { %989 = vmatprep.mubr.bf16.mxu1 %v1439_v21 }
 0x5e8   :  { %990 = vmatmul.mubr.bf16.gmra.mxu1 %v836_v12 }
 0x6a0   :  { %v981_v13 = vpop.f32.mrf.mxu1 }
 0x6a1   :  { %v982_v25 = vadd.f32 %v981_v13, %v860_v20 }
 0x6a2   :  { %v983_v14 = vpop.f32.mrf.mxu1 }
 0x6a3   :  { %v984_v34 = vadd.f32 %v983_v14, %v864_v28 }
 0x6a4   :  { %v985_v15 = vpop.f32.mrf.mxu1 }
 0x6a5   :  { %v986_v21 = vadd.f32 %v985_v15, %v860_v20 }
 0x6a6   :  { %v987_v16 = vpop.f32.mrf.mxu1 }
 0x6a7   :  { %v1000_v27 = vpack.c.bf16 %v986_v21, %v982_v25  ;;  %v988_v42 = vadd.f32 %v987_v16, %v864_v28 }
 0x6a8   :  { %v991_v18 = vpop.f32.mrf.mxu1 }
 0x6a9   :  { %v992_v23 = vadd.f32 %v991_v18, %v860_v20 }
 0x6aa   :  { %v993_v19 = vpop.f32.mrf.mxu1 }
 0x6ab   :  { %v994_v30 = vadd.f32 %v993_v19, %v864_v28 }
 0x6ac   :  { %v995_v22 = vpop.f32.mrf.mxu1 }
 0x6ad   :  { %v996_v24 = vadd.f32 %v995_v22, %v860_v20 }
 0x6ae   :  { %v997_v44 = vpop.f32.mrf.mxu1 }
 0x6af   :  { %v1001_v26 = vpack.c.bf16 %v996_v24, %v992_v23  ;;  %v998_v38 = vadd.f32 %v997_v44, %v864_v28 }
 0x6b1   :  { %1261 = vmatprep.subr.bf16.mxu0 %v1001_v26 }
 0x6b2   :  { %1262 = vmatpush3.bf16.msra.mxu0 %v1001_v26 }
 0x6b3   :  { %1263 = vmatprep.subr.bf16.mxu0 %v1000_v27 }
 0x6b6   :  { %1264 = vmatpush3.bf16.msra.mxu0 %v1000_v27 }
 0x6b9   :  { %1266 = vmatmul.mubr.msk.bf16.vlgmr.msra.gmra.mxu0 %vm323_vm2, %v1525_v57 }
 0x779   :  { %v1267_v29 = vpop.f32.mrf.mxu0 }
 0x77a   :  { %v1053_v31 = vmax.f32 %v1267_v29, 0.0 }
 0x77b   :  { %v1036_v32 = vpop.f32.mrf.mxu0 }
 0x77c   :  { %v1051_v35 = vmax.f32 %v1036_v32, 0.0  ;;  %v1057_v36 = vadd.f32 %v1053_v31, %v994_v30 }
 0x77d   :  { %v1268_v37 = vpop.f32.mrf.mxu0 }
 0x77e   :  { %v1054_v39 = vmax.f32 %v1268_v37, 0.0  ;;  %v1068_v40 = vmul.f32 %v1206_v33, %v1057_v36  ;;  %v1055_v41 = vadd.f32 %v1051_v35, %v984_v34 }
 0x77f   :  { %v1039_v57 = vpop.f32.mrf.mxu0 }
 0x780   :  { %v1058_v9 = vadd.f32 %v1054_v39, %v998_v38  ;;  %v1052_v43 = vmax.f32 %v1039_v57, 0.0  ;;  %1074 = vadd.xlane.f32.xlu1 %v1068_v40  ;;  %v1066_v45 = vmul.f32 %v1206_v33, %v1055_v41 }
 0x782   :  { %v1056_v46 = vadd.f32 %v1052_v43, %v988_v42  ;;  %1070 = vadd.xlane.f32.xlu0 %v1066_v45  ;;  %v1069_v47 = vmul.f32 %v1206_v33, %v1058_v9 }
 0x784   :  { %1076 = vadd.xlane.f32.xlu1 %v1069_v47  ;;  %v1067_v48 = vmul.f32 %v1206_v33, %v1056_v46 }
 0x786   :  { %1072 = vadd.xlane.f32.xlu0 %v1067_v48 }
 0x809   :  { %v1075_v50 = vpop.xlane.xlu1 %1074 }
 0x80a   :  { %v1087_v51 = vadd.f32 %v1207_v49, %v1075_v50 }
 0x80b   :  { %v1071_v52 = vpop.xlane.xlu0 %1070 }
 0x80c   :  { %v1210_v53 = vmul.f32 -1.442695, %v1087_v51  ;;  %v1085_v54 = vadd.f32 %v1207_v49, %v1071_v52 }
 0x80d   :  { %v1077_v55 = vpop.xlane.xlu1 %1076 }
 0x80e   :  { %1375 = vpow2.f32 %v1210_v53  ;;  %v1208_v56 = vmul.f32 -1.442695, %v1085_v54  ;;  %v1088_v58 = vadd.f32 %v1207_v49, %v1077_v55 }
 0x80f   :  { %v1073_v59 = vpop.xlane.xlu0 %1072 }
 0x810   :  { %1377 = vpow2.f32 %v1208_v56  ;;  %v1211_v60 = vmul.f32 -1.442695, %v1088_v58  ;;  %v1086_v61 = vadd.f32 %v1207_v49, %v1073_v59 }
 0x812   :  { %1379 = vpow2.f32 %v1211_v60  ;;  %v1209_v62 = vmul.f32 -1.442695, %v1086_v61 }
 0x814   :  { %1381 = vpow2.f32 %v1209_v62 }
 0x81b   :  { %v1376_v63 = vpop.eup %1375 }
 0x81c   :  { %v1103_v0 = vadd.f32 1.0, %v1376_v63 }
 0x81d   :  { %v1378_v1 = vpop.eup %1377 }
 0x81e   :  { %1383 = vrcp.f32 %v1103_v0  ;;  %v1101_v2 = vadd.f32 1.0, %v1378_v1 }
 0x81f   :  { %v1380_v3 = vpop.eup %1379 }
 0x820   :  { %1385 = vrcp.f32 %v1101_v2  ;;  %v1104_v4 = vadd.f32 1.0, %v1380_v3 }
 0x821   :  { %v1382_v5 = vpop.eup %1381 }
 0x822   :  { %1387 = vrcp.f32 %v1104_v4  ;;  %v1102_v6 = vadd.f32 1.0, %v1382_v5 }
 0x824   :  { %1389 = vrcp.f32 %v1102_v6 }
 0x82b   :  { %v1384_v7 = vpop.eup %1383 }
 0x82c   :  { %1116 = vst.msk [vmem:[%s1590_s8 + $0x10] sm:$0xff] %vm1113_vm3, %v1384_v7 }
 0x82d   :  { %v1386_v8 = vpop.eup %1385 }
 0x82e   :  { %1114 = vst.msk [vmem:[%s1590_s8] sm:$0xff] %vm1113_vm3, %v1386_v8 }
 0x82f   :  { %v1388_v10 = vpop.eup %1387 }
 0x830   :  { %1117 = vst.msk [vmem:[%s1590_s8 + $0x18] sm:$0xff] %vm1113_vm3, %v1388_v10 }
 0x831   :  { %v1390_v11 = vpop.eup %1389 }
 0x832   :  { %1115 = vst.msk [vmem:[%s1590_s8 + $0x8] sm:$0xff] %vm1113_vm3, %v1390_v11 }
 0x833   :  { %1122 = vsyncpa [#allocation4], 1 }
 0x834   :  { %1123 = vsyncpa [#allocation6], 1 }

</bundles_post_ra>
